<compile_context>
chip_gen: v7x
topology: tpu7x:2x2x1
jax: 0.10.0
libtpu: 0.0.40
codegen_flags: <defaults>
</compile_context>

<pallas_src>
import functools

import jax
import jax.numpy as jnp
from jax.experimental import pallas as pl
from jax.experimental.pallas import tpu as pltpu


# ---------------------------------------------------------------------------
# Requant helpers (params are static Python numbers; folded at trace time).
# ---------------------------------------------------------------------------
def _clip_bounds(n_levels, signed):
    if signed:
        return -n_levels / 2.0, n_levels / 2.0 - 1.0
    return 0.0, n_levels - 1.0


def _requant(x, params):
    """Folded DORY RequantShift: clip(floor(x*(mul/div) + add/div), lo, hi)."""
    if params is None:          # requant module is None -> identity
        return x
    mul, add, div, n_levels, signed = params
    idiv = int(div)
    # Folding is bit-exact only because div is a power of two.
    assert idiv > 0 and (idiv & (idiv - 1)) == 0, "DORY requant div must be 2^shift"
    m = float(mul) / float(div)
    a = float(add) / float(div)
    y = jnp.floor(x * m + a)
    lo, hi = _clip_bounds(float(n_levels), bool(signed))
    return jnp.clip(y, lo, hi)


def _requant_ref(x, params):
    """Unfolded reference form, matching the PyTorch module literally."""
    if params is None:
        return x
    mul, add, div, n_levels, signed = params
    y = jnp.floor((x * mul + add) / div)
    lo, hi = _clip_bounds(float(n_levels), bool(signed))
    return jnp.clip(y, lo, hi)


# ---------------------------------------------------------------------------
# Pallas kernel: elementwise requant -> add -> requant on a (block_rows, lanes)
# tile.  Arithmetic is kept in f32 (mandatory on v5e: no bf16 VPU).
# ---------------------------------------------------------------------------
def _dory_adder_kernel(x1_ref, x2_ref, o_ref, *, rq1, rq2, rq_out):
    x1 = x1_ref[...].astype(jnp.float32)
    x2 = x2_ref[...].astype(jnp.float32)
    s = _requant(x1, rq1) + _requant(x2, rq2)
    o_ref[...] = _requant(s, rq_out).astype(o_ref.dtype)


# ---------------------------------------------------------------------------
# Wrapper: NCHW glue + pallas_call.
# ---------------------------------------------------------------------------
def dory_adder(x1, x2, *, rq1, rq2, rq_out, lanes=512, max_block_rows=1024):
    assert x1.shape == x2.shape, "DORYAdder requires matching input shapes"
    assert x1.dtype == x2.dtype
    assert lanes % 128 == 0

    orig_shape = x1.shape
    total = x1.size

    # Flatten to a lane-dense 2-D view (last dim = `lanes`).
    x1f = x1.reshape(-1)
    x2f = x2.reshape(-1)

    # Block sizing: shrink for small inputs so padding stays tiny; cap at
    # (max_block_rows, lanes) so pipelined VMEM (3 x 2 x block bytes) stays
    # comfortably inside every generation's VMEM budget.
    rows_needed = pl.cdiv(total, lanes)
    block_rows = min(max_block_rows, max(8, ((rows_needed + 7) // 8) * 8))
    block_elems = block_rows * lanes

    # Zero-pad the tail so the grid covers whole blocks.  Padded elements are
    # computed (harmless: pure elementwise) and sliced off below.
    # NOTE: jnp.pad copies; for peak perf feed sizes divisible by block_elems.
    padded_total = pl.cdiv(total, block_elems) * block_elems
    if padded_total != total:
        pad = padded_total - total
        x1f = jnp.pad(x1f, (0, pad))
        x2f = jnp.pad(x2f, (0, pad))

    rows = padded_total // lanes
    grid = rows // block_rows

    x1f = x1f.reshape(rows, lanes)
    x2f = x2f.reshape(rows, lanes)

    kernel = functools.partial(_dory_adder_kernel, rq1=rq1, rq2=rq2, rq_out=rq_out)

    out = pl.pallas_call(
        kernel,
        out_shape=jax.ShapeDtypeStruct((rows, lanes), x1.dtype),
        grid_spec=pltpu.PrefetchScalarGridSpec(
            num_scalar_prefetch=0,
            grid=(grid,),
            in_specs=[
                pl.BlockSpec((block_rows, lanes), lambda i: (i, 0)),
                pl.BlockSpec((block_rows, lanes), lambda i: (i, 0)),
            ],
            out_specs=pl.BlockSpec((block_rows, lanes), lambda i: (i, 0)),
        ),
        compiler_params=pltpu.CompilerParams(
            # Single independent axis: sharded across both TensorCores on v7x.
            dimension_semantics=("parallel",),
            # 12 MiB actual usage; 32 MiB limit is safe on v5e/v6e/v7x.
            vmem_limit_bytes=32 * 1024 * 1024,
        ),
    )(x1f, x2f)

    return out.reshape(-1)[:total].reshape(orig_shape)


# Pure-JAX reference for correctness checking (literal module semantics).
def dory_adder_ref(x1, x2, *, rq1, rq2, rq_out):
    y1 = _requant_ref(x1, rq1)
    y2 = _requant_ref(x2, rq2)
    return _requant_ref(y1 + y2, rq_out)


if __name__ == "__main__":
    # Deterministic requant parameters: (mul, add, div(=2^shift), n_levels, signed)
    RQ_IN1 = (3.0, 7.0, 2.0 ** 4, 256.0, False)
    RQ_IN2 = (5.0, 3.0, 2.0 ** 3, 256.0, False)
    RQ_OUT = (2.0, 1.0, 2.0 ** 5, 256.0, True)

    key = jax.random.PRNGKey(0)
    k1, k2 = jax.random.split(key)
    shape = (2, 4, 16, 16)  # NCHW
    # Integer-valued float32 activations, as produced by fake-quant pipelines.
    x1 = jax.random.randint(k1, shape, 0, 256).astype(jnp.float32)
    x2 = jax.random.randint(k2, shape, 0, 256).astype(jnp.float32)

    out = dory_adder(x1, x2, rq1=RQ_IN1, rq2=RQ_IN2, rq_out=RQ_OUT)
    out = jax.block_until_ready(out)

    ref = dory_adder_ref(x1, x2, rq1=RQ_IN1, rq2=RQ_IN2, rq_out=RQ_OUT)
    assert out.shape == shape and out.dtype == jnp.float32
    assert jnp.array_equal(out, ref), "mismatch vs reference"

    # Also exercise a larger / non-divisible shape to cover padding + multi-step grid.
    shape2 = (2, 24, 28, 28)  # 37632 elements, not a multiple of the block size
    k3, k4 = jax.random.split(k2)
    a = jax.random.randint(k3, shape2, 0, 256).astype(jnp.float32)
    b = jax.random.randint(k4, shape2, 0, 256).astype(jnp.float32)
    out2 = jax.block_until_ready(
        dory_adder(a, b, rq1=RQ_IN1, rq2=None, rq_out=RQ_OUT))
    ref2 = dory_adder_ref(a, b, rq1=RQ_IN1, rq2=None, rq_out=RQ_OUT)
    assert jnp.array_equal(out2, ref2), "mismatch vs reference (padded case)"

    print("KERNEL_OK")
</pallas_src>

<mosaic_0001>
module attributes {stable_mosaic.version = 11 : i64} {
  func.func @_dory_adder_kernel(%arg0: i32, %arg1: memref<8x512xf32, #tpu.memory_space<vmem>>, %arg2: memref<8x512xf32, #tpu.memory_space<vmem>>, %arg3: memref<8x512xf32, #tpu.memory_space<vmem>>) attributes {dimension_semantics = [#tpu.dimension_semantics<parallel>], iteration_bounds = array<i64: 1>, scalar_prefetch = 0 : i64, scratch_operands = 0 : i64, tpu.core_type = #tpu.core_type<tc>, window_params = [{transform_indices = @transform_0, window_bounds = array<i64: 8, 512>}, {transform_indices = @transform_1, window_bounds = array<i64: 8, 512>}, {transform_indices = @transform_2, window_bounds = array<i64: 8, 512>}]} {
    %c0 = arith.constant 0 : index
    %c0_0 = arith.constant 0 : index
    %0 = vector.load %arg1[%c0, %c0_0] : memref<8x512xf32, #tpu.memory_space<vmem>>, vector<8x512xf32>
    %c0_1 = arith.constant 0 : index
    %c0_2 = arith.constant 0 : index
    %1 = vector.load %arg2[%c0_1, %c0_2] : memref<8x512xf32, #tpu.memory_space<vmem>>, vector<8x512xf32>
    %cst = arith.constant 1.875000e-01 : f32
    %2 = vector.broadcast %cst : f32 to vector<8x512xf32>
    %3 = arith.mulf %0, %2 : vector<8x512xf32>
    %cst_3 = arith.constant 4.375000e-01 : f32
    %4 = vector.broadcast %cst_3 : f32 to vector<8x512xf32>
    %5 = arith.addf %3, %4 : vector<8x512xf32>
    %6 = math.floor %5 : vector<8x512xf32>
    %cst_4 = arith.constant 0.000000e+00 : f32
    %cst_5 = arith.constant 2.550000e+02 : f32
    %7 = vector.broadcast %cst_4 : f32 to vector<8x512xf32>
    %8 = arith.maximumf %7, %6 : vector<8x512xf32>
    %9 = vector.broadcast %cst_5 : f32 to vector<8x512xf32>
    %10 = arith.minimumf %9, %8 : vector<8x512xf32>
    %cst_6 = arith.constant 6.250000e-01 : f32
    %11 = vector.broadcast %cst_6 : f32 to vector<8x512xf32>
    %12 = arith.mulf %1, %11 : vector<8x512xf32>
    %cst_7 = arith.constant 3.750000e-01 : f32
    %13 = vector.broadcast %cst_7 : f32 to vector<8x512xf32>
    %14 = arith.addf %12, %13 : vector<8x512xf32>
    %15 = math.floor %14 : vector<8x512xf32>
    %cst_8 = arith.constant 0.000000e+00 : f32
    %cst_9 = arith.constant 2.550000e+02 : f32
    %16 = vector.broadcast %cst_8 : f32 to vector<8x512xf32>
    %17 = arith.maximumf %16, %15 : vector<8x512xf32>
    %18 = vector.broadcast %cst_9 : f32 to vector<8x512xf32>
    %19 = arith.minimumf %18, %17 : vector<8x512xf32>
    %20 = arith.addf %10, %19 : vector<8x512xf32>
    %cst_10 = arith.constant 6.250000e-02 : f32
    %21 = vector.broadcast %cst_10 : f32 to vector<8x512xf32>
    %22 = arith.mulf %20, %21 : vector<8x512xf32>
    %cst_11 = arith.constant 3.125000e-02 : f32
    %23 = vector.broadcast %cst_11 : f32 to vector<8x512xf32>
    %24 = arith.addf %22, %23 : vector<8x512xf32>
    %25 = math.floor %24 : vector<8x512xf32>
    %cst_12 = arith.constant -1.280000e+02 : f32
    %cst_13 = arith.constant 1.270000e+02 : f32
    %26 = vector.broadcast %cst_12 : f32 to vector<8x512xf32>
    %27 = arith.maximumf %26, %25 : vector<8x512xf32>
    %28 = vector.broadcast %cst_13 : f32 to vector<8x512xf32>
    %29 = arith.minimumf %28, %27 : vector<8x512xf32>
    %c0_14 = arith.constant 0 : index
    %c0_15 = arith.constant 0 : index
    %30 = vector.load %arg3[%c0_14, %c0_15] : memref<8x512xf32, #tpu.memory_space<vmem>>, vector<8x512xf32>
    tpu.vector_store %arg3[%c0_14, %c0_15], %29 {strides = array<i32>} : memref<8x512xf32, #tpu.memory_space<vmem>>, vector<8x512xf32>,
    return
  }
  func.func @transform_0(%arg0: i32) -> (i32, i32) {
    %c0_i32 = arith.constant 0 : i32
    %c0_i32_0 = arith.constant 0 : i32
    return %arg0, %c0_i32 : i32, i32
  }
  func.func @transform_1(%arg0: i32) -> (i32, i32) {
    %c0_i32 = arith.constant 0 : i32
    %c0_i32_0 = arith.constant 0 : i32
    return %arg0, %c0_i32 : i32, i32
  }
  func.func @transform_2(%arg0: i32) -> (i32, i32) {
    %c0_i32 = arith.constant 0 : i32
    %c0_i32_0 = arith.constant 0 : i32
    return %arg0, %c0_i32 : i32, i32
  }
}

</mosaic_0001>

<bundles_post_ra>
// kernel: tpu_custom_call.1
= control target key start
LH: loop header
LB: loop body
LE: loop exit
PB: predicated region body
PF: predicated region fallthrough
CT: control target
= control target key end

     0   :  { %7 = vsyncpa [#allocation3], 0  ;;  %s257_s0 = inlined_call_operand.hbm [shape: f32[8,512], index: 0, kind: input, shape index: {}]   ;;  %s258_s1 = inlined_call_operand.hbm [shape: f32[8,512], index: 1, kind: input, shape index: {}]   ;;  %s259_s2 = inlined_call_operand.hbm [shape: f32[8,512], index: 2, kind: output, shape index: {}]  }
   0x1   :  { %8 = vsyncpa [#allocation6], 0 }
   0x2   :  { %9 = vsyncpa [#allocation4], 0  ;;  %s203_s9 = smov [#allocation2]   ;;  %s204_s11 = smov [#allocation5]  }
   0x3   :  { %s16_s10 = sshll.u32 %s203_s9, 4  ;;  %s26_s12 = sshll.u32 %s204_s11, 4  ;;  %s17_s10 = int_to_ptr.vmem [resolvable:$true] %s16_s10  ;;  %s27_s12 = int_to_ptr.vmem [resolvable:$true] %s26_s12 }
   0x4   :  { %s131_s15 = scalar_lea.hbm %s257_s0, 512 }
   0x5   :  { %p132_p0 = scmp.ne.s32.totalorder %s257_s0, %s131_s15  ;;  %p135_p1 = scmp.lt.u32.totalorder %s131_s15, %s257_s0 }
   0x7   :  { %p137_p2 = pnand %p135_p1, %p132_p0 }
   0x9   :  { %140 = shalt.err (!%p137_p2)
}
   0xa   :  { %s141_s20 = scalar_lea.vmem %s17_s10, 512  ;;  %p146_p4 = scmp.lt.s32.totalorder %s17_s10, %s17_s10 }
   0xb   :  { %p142_p3 = scmp.ne.s32.totalorder %s17_s10, %s141_s20  ;;  %p147_p5 = scmp.lt.s32.totalorder %s141_s20, %s141_s20 }
   0xd   :  { %p148_p6 = por %p147_p5, %p146_p4 }
   0xf   :  { %p149_p7 = pnand %p148_p6, %p142_p3 }
  0x11   :  { %152 = shalt.err (!%p149_p7)
}
  0x12   :  { %19 = dma.hbm_to_vmem [thread:$0]  %s257_s0, 512, %s17_s10, [#allocation3]  }
  0x13   :  { %s153_s25 = scalar_lea.hbm %s258_s1, 512 }
  0x14   :  { %p154_p8 = scmp.ne.s32.totalorder %s258_s1, %s153_s25  ;;  %p157_p9 = scmp.lt.u32.totalorder %s153_s25, %s258_s1 }
  0x16   :  { %p159_p10 = pnand %p157_p9, %p154_p8 }
  0x18   :  { %162 = shalt.err (!%p159_p10)
}
  0x19   :  { %s163_s30 = scalar_lea.vmem %s27_s12, 512  ;;  %p168_p12 = scmp.lt.s32.totalorder %s27_s12, %s27_s12 }
  0x1a   :  { %p164_p11 = scmp.ne.s32.totalorder %s27_s12, %s163_s30  ;;  %p169_p13 = scmp.lt.s32.totalorder %s163_s30, %s163_s30 }
  0x1c   :  { %p170_p0 = por %p169_p13, %p168_p12 }
  0x1e   :  { %p171_p1 = pnand %p170_p0, %p164_p11 }
  0x20   :  { %174 = shalt.err (!%p171_p1)
}
  0x21   :  { %29 = dma.hbm_to_vmem [thread:$0]  %s258_s1, 512, %s27_s12, [#allocation6]  }
  0x22   :  { %197 = dma.done.wait [#allocation3], 512  }
  0x23   :  { %198 = vsyncadd [#allocation3], 4294966784 }
  0x24   :  { %199 = dma.done.wait [#allocation6], 512  }
  0x25   :  { %200 = vsyncadd [#allocation6], 4294966784  ;;  %v36_v0 = vld [vmem:[#allocation2] sm:$0xff]  ;;  %v37_v2 = vld [vmem:[#allocation2 + $0x8] sm:$0xff]  ;;  %s205_s1 = smov [#allocation7]  }
  0x26   :  { %v40_v1 = vld [vmem:[#allocation5] sm:$0xff]  ;;  %v44_v3 = vmul.f32 0.1875, %v36_v0  ;;  %v41_v5 = vld [vmem:[#allocation5 + $0x8] sm:$0xff]  ;;  %v45_v6 = vmul.f32 0.1875, %v37_v2  ;;  %v38_v7 = vld [vmem:[#allocation2 + $0x10] sm:$0xff]  ;;  %s118_s4 = sshll.u32 %s205_s1, 4  ;;  %s119_s4 = int_to_ptr.vmem [resolvable:$true] %s118_s4 }
  0x27   :  { %v64_v4 = vmul.f32 0.625, %v40_v1  ;;  %v42_v8 = vld [vmem:[#allocation5 + $0x10] sm:$0xff]  ;;  %v65_v9 = vmul.f32 0.625, %v41_v5  ;;  %v46_v10 = vmul.f32 0.1875, %v38_v7  ;;  %v39_v12 = vld [vmem:[#allocation2 + $0x18] sm:$0xff]  ;;  %s175_s5 = scalar_lea.vmem %s119_s4, 512  ;;  %p180_p3 = scmp.lt.s32.totalorder %s119_s4, %s119_s4 }
  0x28   :  { %v66_v11 = vmul.f32 0.625, %v42_v8  ;;  %v43_v13 = vld [vmem:[#allocation5 + $0x18] sm:$0xff]  ;;  %v48_v14 = vadd.f32 0.4375, %v44_v3  ;;  %v49_v16 = vadd.f32 0.4375, %v45_v6  ;;  %v47_v17 = vmul.f32 0.1875, %v39_v12  ;;  %p176_p2 = scmp.ne.s32.totalorder %s119_s4, %s175_s5  ;;  %p181_p4 = scmp.lt.s32.totalorder %s175_s5, %s175_s5 }
  0x29   :  { %v68_v15 = vadd.f32 0.375, %v64_v4  ;;  %v69_v18 = vadd.f32 0.375, %v65_v9  ;;  %v50_v19 = vadd.f32 0.4375, %v46_v10  ;;  %v67_v21 = vmul.f32 0.625, %v43_v13 }
  0x2a   :  { %v70_v20 = vadd.f32 0.375, %v66_v11  ;;  %v52_v22 = vfloor.f32 %v48_v14  ;;  %v53_v24 = vfloor.f32 %v49_v16  ;;  %v51_v25 = vadd.f32 0.4375, %v47_v17  ;;  %p182_p5 = por %p181_p4, %p180_p3 }
  0x2b   :  { %v72_v23 = vfloor.f32 %v68_v15  ;;  %v73_v26 = vfloor.f32 %v69_v18  ;;  %v54_v27 = vfloor.f32 %v50_v19  ;;  %v71_v29 = vadd.f32 0.375, %v67_v21 }
  0x2c   :  { %v74_v28 = vfloor.f32 %v70_v20  ;;  %v56_v30 = vmax.f32 %v52_v22, 0.0  ;;  %v57_v32 = vmax.f32 %v53_v24, 0.0  ;;  %v55_v33 = vfloor.f32 %v51_v25  ;;  %p183_p6 = pnand %p182_p5, %p176_p2 }
  0x2d   :  { %v76_v31 = vmax.f32 %v72_v23, 0.0  ;;  %v77_v34 = vmax.f32 %v73_v26, 0.0  ;;  %v58_v35 = vmax.f32 %v54_v27, 0.0  ;;  %v75_v37 = vfloor.f32 %v71_v29 }
  0x2e   :  { %v78_v36 = vmax.f32 %v74_v28, 0.0  ;;  %v60_v38 = vmin.f32 %v56_v30, 255.0  ;;  %v61_v40 = vmin.f32 %v57_v32, 255.0  ;;  %v59_v41 = vmax.f32 %v55_v33, 0.0 }
  0x2f   :  { %v80_v39 = vmin.f32 %v76_v31, 255.0  ;;  %v81_v42 = vmin.f32 %v77_v34, 255.0  ;;  %v62_v43 = vmin.f32 %v58_v35, 255.0  ;;  %v79_v45 = vmax.f32 %v75_v37, 0.0 }
  0x30   :  { %v82_v44 = vmin.f32 %v78_v36, 255.0  ;;  %v63_v47 = vmin.f32 %v59_v41, 255.0 }
  0x31   :  { %v84_v46 = vadd.f32 %v80_v39, %v60_v38  ;;  %v85_v48 = vadd.f32 %v81_v42, %v61_v40  ;;  %v83_v50 = vmin.f32 %v79_v45, 255.0 }
  0x32   :  { %v86_v49 = vadd.f32 %v82_v44, %v62_v43 }
  0x33   :  { %v88_v51 = vmul.f32 0.0625, %v84_v46  ;;  %v89_v52 = vmul.f32 0.0625, %v85_v48  ;;  %v87_v54 = vadd.f32 %v83_v50, %v63_v47 }
  0x34   :  { %v90_v53 = vmul.f32 0.0625, %v86_v49 }
  0x35   :  { %v92_v55 = vadd.f32 0.03125, %v88_v51  ;;  %v93_v56 = vadd.f32 0.03125, %v89_v52  ;;  %v91_v58 = vmul.f32 0.0625, %v87_v54 }
  0x36   :  { %v94_v57 = vadd.f32 0.03125, %v90_v53 }
  0x37   :  { %v96_v59 = vfloor.f32 %v92_v55  ;;  %v97_v60 = vfloor.f32 %v93_v56  ;;  %v95_v62 = vadd.f32 0.03125, %v91_v58 }
  0x38   :  { %v98_v61 = vfloor.f32 %v94_v57 }
  0x39   :  { %v100_v63 = vmax.f32 %v96_v59, -128.0  ;;  %v101_v0 = vmax.f32 %v97_v60, -128.0  ;;  %v99_v2 = vfloor.f32 %v95_v62 }
  0x3a   :  { %v102_v1 = vmax.f32 %v98_v61, -128.0 }
  0x3b   :  { %v104_v3 = vmin.f32 %v100_v63, 127.0  ;;  %v105_v4 = vmin.f32 %v101_v0, 127.0  ;;  %v103_v6 = vmax.f32 %v99_v2, -128.0 }
  0x3c   :  { %v106_v5 = vmin.f32 %v102_v1, 127.0 }
  0x3d   :  { %108 = vst [vmem:[#allocation7] sm:$0xff] %v104_v3  ;;  %109 = vst [vmem:[#allocation7 + $0x8] sm:$0xff] %v105_v4  ;;  %v107_v7 = vmin.f32 %v103_v6, 127.0 }
  0x3e   :  { %110 = vst [vmem:[#allocation7 + $0x10] sm:$0xff] %v106_v5 }
  0x3f   :  { %111 = vst [vmem:[#allocation7 + $0x18] sm:$0xff] %v107_v7 }
  0x40   :  { %186 = shalt.err (!%p183_p6)
}
  0x41   :  { %s187_s8 = scalar_lea.hbm %s259_s2, 512 }
  0x42   :  { %p188_p7 = scmp.ne.s32.totalorder %s259_s2, %s187_s8  ;;  %p191_p8 = scmp.lt.u32.totalorder %s187_s8, %s259_s2 }
  0x44   :  { %p193_p9 = pnand %p191_p8, %p188_p7 }
  0x46   :  { %196 = shalt.err (!%p193_p9)
}
  0x47   :  { %121 = dma.vmem_to_hbm [thread:$0]  %s119_s4, 512, %s259_s2, [#allocation4]  }
  0x48   :  { %201 = dma.done.wait [#allocation4], 512  }
  0x49   :  { %202 = vsyncadd [#allocation4], 4294966784 }
  0x4a   :  { %125 = vsyncpa [#allocation3], 1 }
  0x4b   :  { %126 = vsyncpa [#allocation6], 1 }
  0x4c   :  { %127 = vsyncpa [#allocation4], 1 }

</bundles_post_ra>
